<compile_context>
chip_gen: v7x
topology: tpu7x:2x2x1
jax: 0.10.0
libtpu: 0.0.40
codegen_flags: <defaults>
</compile_context>

<pallas_src>
import functools

import jax
import jax.numpy as jnp
from jax.experimental import pallas as pl
from jax.experimental.pallas import tpu as pltpu

DROPOUT = 0.5
INPUT_SIZE = 28 * 28          # 784
NUM_CLASSES = 10
LANE = 128
SUBLANE = 8

KP = ((INPUT_SIZE + LANE - 1) // LANE) * LANE      # 896 = 7 * 128
NP = ((NUM_CLASSES + LANE - 1) // LANE) * LANE     # 128
NEG_BIG = -1e30                                    # acts as -inf for padded classes


def _round_up(n, m):
    return ((n + m - 1) // m) * m


# ----------------------------------------------------------------------------
# Kernels
# ----------------------------------------------------------------------------
def _softmax_store(logits, o_ref):
    # Numerically stable softmax over the (lane-dense, 128-wide) class dim.
    m = jnp.max(logits, axis=-1, keepdims=True)
    e = jnp.exp(logits - m)
    # One reciprocal per row + broadcast multiply (cheaper than 128 divides).
    # NOTE: pl.reciprocal(..., approx=True) would push this onto the EUP on TPU;
    # plain divide kept for portability with the interpret/CPU test harness.
    inv = 1.0 / jnp.sum(e, axis=-1, keepdims=True)
    o_ref[...] = (e * inv).astype(o_ref.dtype)


def _mlp_eval_kernel(x_ref, w1_ref, b1_ref, w2_ref, b2_ref, o_ref):
    # hidden layer: bf16 MXU inputs, f32 accumulation
    h = jnp.dot(x_ref[...], w1_ref[...], preferred_element_type=jnp.float32)
    h = jnp.maximum(h + b1_ref[...], 0.0)
    # F.dropout with training=False is the identity.
    logits = jnp.dot(h.astype(jnp.bfloat16), w2_ref[...],
                     preferred_element_type=jnp.float32) + b2_ref[...]
    _softmax_store(logits, o_ref)


def _mlp_train_kernel(threshold, scale,
                      x_ref, w1_ref, b1_ref, w2_ref, b2_ref, bits_ref, o_ref):
    h = jnp.dot(x_ref[...], w1_ref[...], preferred_element_type=jnp.float32)
    h = jnp.maximum(h + b1_ref[...], 0.0)
    # Dropout: drop with prob p, scale survivors by 1/(1-p).  Integer threshold
    # test directly on the uniform uint32 bits.
    keep = bits_ref[...] >= jnp.uint32(threshold)
    h = jnp.where(keep, h * jnp.float32(scale), 0.0)
    logits = jnp.dot(h.astype(jnp.bfloat16), w2_ref[...],
                     preferred_element_type=jnp.float32) + b2_ref[...]
    _softmax_store(logits, o_ref)


# ----------------------------------------------------------------------------
# Parameters
# ----------------------------------------------------------------------------
def init_params(key, hidden_size):
    """PyTorch-style uniform(+/- 1/sqrt(fan_in)) init, weights pre-transposed
    to (in_features, out_features)."""
    k1, k2, k3, k4 = jax.random.split(key, 4)
    lim1 = 1.0 / (INPUT_SIZE ** 0.5)
    lim2 = 1.0 / (hidden_size ** 0.5)
    w1 = jax.random.uniform(k1, (INPUT_SIZE, hidden_size), jnp.float32, -lim1, lim1)
    b1 = jax.random.uniform(k2, (hidden_size,), jnp.float32, -lim1, lim1)
    w2 = jax.random.uniform(k3, (hidden_size, NUM_CLASSES), jnp.float32, -lim2, lim2)
    b2 = jax.random.uniform(k4, (NUM_CLASSES,), jnp.float32, -lim2, lim2)
    return w1, b1, w2, b2


def pack_params(params):
    """Pad to lane-dense shapes and cast MXU operands to bf16 (one-time prep).

    Zero-padded input features / hidden units are mathematically inert through
    the dots and ReLU; padded output classes get bias -1e30 so softmax assigns
    them ~zero probability.
    """
    w1, b1, w2, b2 = params
    h = w1.shape[1]
    hp = _round_up(h, LANE)
    w1p = jnp.zeros((KP, hp), jnp.float32).at[:INPUT_SIZE, :h].set(w1)
    b1p = jnp.zeros((1, hp), jnp.float32).at[0, :h].set(b1)
    w2p = jnp.zeros((hp, NP), jnp.float32).at[:h, :NUM_CLASSES].set(w2)
    b2p = jnp.full((1, NP), NEG_BIG, jnp.float32).at[0, :NUM_CLASSES].set(b2)
    return (w1p.astype(jnp.bfloat16), b1p, w2p.astype(jnp.bfloat16), b2p)


# ----------------------------------------------------------------------------
# Forward
# ----------------------------------------------------------------------------
def mnist_forward(x, packed_params, *, training=False, dropout=DROPOUT, seed=0):
    w1p, b1p, w2p, b2p = packed_params
    hp = w1p.shape[1]
    B = x.shape[0]

    # Batch tile: big enough to pipeline / fill the MXU, small enough that
    # 2 x (x tile) + resident weights + 2 x (out tile) stays well under the
    # scoped VMEM limit on every chip (v5e/v6e/v7x).
    TB = min(256, _round_up(max(B, 1), SUBLANE))
    B_pad = _round_up(B, TB)
    grid = (pl.cdiv(B_pad, TB),)

    # Pad batch to a tile multiple, features to 896, and cast to bf16.
    xp = jnp.zeros((B_pad, KP), jnp.bfloat16).at[:B, :INPUT_SIZE].set(
        x.astype(jnp.bfloat16))

    x_spec = pl.BlockSpec((TB, KP), lambda i: (i, 0))
    w1_spec = pl.BlockSpec((KP, hp), lambda i: (0, 0))
    b1_spec = pl.BlockSpec((1, hp), lambda i: (0, 0))
    w2_spec = pl.BlockSpec((hp, NP), lambda i: (0, 0))
    b2_spec = pl.BlockSpec((1, NP), lambda i: (0, 0))
    out_spec = pl.BlockSpec((TB, NP), lambda i: (i, 0))

    out_shape = jax.ShapeDtypeStruct((B_pad, NP), jnp.float32)
    compiler_params = pltpu.CompilerParams(
        dimension_semantics=("parallel",),      # shard batch tiles across TCs
        vmem_limit_bytes=32 * 1024 * 1024,
    )

    if not training:
        y = pl.pallas_call(
            _mlp_eval_kernel,
            out_shape=out_shape,
            grid=grid,
            in_specs=[x_spec, w1_spec, b1_spec, w2_spec, b2_spec],
            out_specs=out_spec,
            compiler_params=compiler_params,
        )(xp, w1p, b1p, w2p, b2p)
    else:
        if not (0.0 <= float(dropout) < 1.0):
            raise ValueError("dropout must be in [0, 1)")
        threshold = min(int(round(float(dropout) * 2.0 ** 32)), 2 ** 32 - 1)
        scale = 1.0 / (1.0 - float(dropout))
        bits = jax.random.bits(jax.random.PRNGKey(seed), (B_pad, hp), jnp.uint32)
        bits_spec = pl.BlockSpec((TB, hp), lambda i: (i, 0))
        y = pl.pallas_call(
            functools.partial(_mlp_train_kernel, threshold, scale),
            out_shape=out_shape,
            grid=grid,
            in_specs=[x_spec, w1_spec, b1_spec, w2_spec, b2_spec, bits_spec],
            out_specs=out_spec,
            compiler_params=compiler_params,
        )(xp, w1p, b1p, w2p, b2p, bits)

    return y[:B, :NUM_CLASSES]


# ----------------------------------------------------------------------------
# Pure-JAX reference (same padded bf16 params) and demo
# ----------------------------------------------------------------------------
def _reference_eval(x, packed_params):
    w1p, b1p, w2p, b2p = packed_params
    xp = jnp.zeros((x.shape[0], KP), jnp.bfloat16).at[:, :INPUT_SIZE].set(
        x.astype(jnp.bfloat16))
    h = jnp.maximum(
        jnp.dot(xp, w1p, preferred_element_type=jnp.float32) + b1p, 0.0)
    logits = jnp.dot(h.astype(jnp.bfloat16), w2p,
                     preferred_element_type=jnp.float32) + b2p
    return jax.nn.softmax(logits, axis=-1)[:, :NUM_CLASSES]


if __name__ == "__main__":
    key = jax.random.PRNGKey(0)
    k_x, k_p = jax.random.split(key)

    B, HIDDEN = 8, 32
    x = jax.random.normal(k_x, (B, INPUT_SIZE), dtype=jnp.float32)
    params = init_params(k_p, HIDDEN)
    packed = pack_params(params)

    # eval mode (dropout is identity) -- check against pure-JAX reference
    y = jax.block_until_ready(mnist_forward(x, packed, training=False))
    y_ref = _reference_eval(x, packed)
    assert y.shape == (B, NUM_CLASSES)
    assert jnp.allclose(y, y_ref, atol=2e-3, rtol=1e-3)
    assert jnp.allclose(jnp.sum(y, axis=-1), 1.0, atol=1e-3)

    # training mode with p=0: dropout is a no-op, must match eval output.
    y_t0 = jax.block_until_ready(
        mnist_forward(x, packed, training=True, dropout=0.0, seed=7))
    assert jnp.allclose(y_t0, y, atol=1e-6)

    # training mode with p=0.5: exercise the masked dropout path.
    y_tr = jax.block_until_ready(
        mnist_forward(x, packed, training=True, dropout=DROPOUT, seed=42))
    assert y_tr.shape == (B, NUM_CLASSES)
    assert bool(jnp.all(jnp.isfinite(y_tr)))
    assert jnp.allclose(jnp.sum(y_tr, axis=-1), 1.0, atol=1e-3)

    print("KERNEL_OK")
</pallas_src>

<mosaic_0001>
module attributes {stable_mosaic.version = 11 : i64} {
  func.func @_mlp_eval_kernel(%arg0: i32, %arg1: memref<8x896xbf16, #tpu.memory_space<vmem>>, %arg2: memref<896x128xbf16, #tpu.memory_space<vmem>>, %arg3: memref<1x128xf32, #tpu.memory_space<vmem>>, %arg4: memref<128x128xbf16, #tpu.memory_space<vmem>>, %arg5: memref<1x128xf32, #tpu.memory_space<vmem>>, %arg6: memref<8x128xf32, #tpu.memory_space<vmem>>) attributes {dimension_semantics = [#tpu.dimension_semantics<parallel>], iteration_bounds = array<i64: 1>, scalar_prefetch = 0 : i64, scratch_operands = 0 : i64, tpu.core_type = #tpu.core_type<tc>, window_params = [{transform_indices = @transform_0, window_bounds = array<i64: 8, 896>}, {pipeline_mode = #tpu.pipeline_mode<synchronous>, transform_indices = @transform_1, window_bounds = array<i64: 896, 128>}, {pipeline_mode = #tpu.pipeline_mode<synchronous>, transform_indices = @transform_2, window_bounds = array<i64: 1, 128>}, {pipeline_mode = #tpu.pipeline_mode<synchronous>, transform_indices = @transform_3, window_bounds = array<i64: 128, 128>}, {pipeline_mode = #tpu.pipeline_mode<synchronous>, transform_indices = @transform_4, window_bounds = array<i64: 1, 128>}, {transform_indices = @transform_5, window_bounds = array<i64: 8, 128>}]} {
    %c0 = arith.constant 0 : index
    %c0_0 = arith.constant 0 : index
    %0 = vector.load %arg1[%c0, %c0_0] : memref<8x896xbf16, #tpu.memory_space<vmem>>, vector<8x896xbf16>
    %c0_1 = arith.constant 0 : index
    %c0_2 = arith.constant 0 : index
    %1 = vector.load %arg2[%c0_1, %c0_2] : memref<896x128xbf16, #tpu.memory_space<vmem>>, vector<896x128xbf16>
    %cst = arith.constant dense<0.000000e+00> : vector<8x128xf32>
    %2 = tpu.matmul %0, %1, %cst {dimension_numbers = #tpu.dot_dimension_numbers<[1], [0], [0], [1], [0, 0, 1, 1], [], []>} : vector<8x896xbf16>, vector<896x128xbf16>, vector<8x128xf32> -> vector<8x128xf32>
    %c0_3 = arith.constant 0 : index
    %c0_4 = arith.constant 0 : index
    %3 = vector.load %arg3[%c0_3, %c0_4] : memref<1x128xf32, #tpu.memory_space<vmem>>, vector<1x128xf32>
    %4 = vector.broadcast %3 : vector<1x128xf32> to vector<8x128xf32>
    %5 = arith.addf %2, %4 : vector<8x128xf32>
    %cst_5 = arith.constant 0.000000e+00 : f32
    %6 = vector.broadcast %cst_5 : f32 to vector<8x128xf32>
    %7 = arith.maximumf %5, %6 : vector<8x128xf32>
    %8 = arith.truncf %7 : vector<8x128xf32> to vector<8x128xbf16>
    %c0_6 = arith.constant 0 : index
    %c0_7 = arith.constant 0 : index
    %9 = vector.load %arg4[%c0_6, %c0_7] : memref<128x128xbf16, #tpu.memory_space<vmem>>, vector<128x128xbf16>
    %cst_8 = arith.constant dense<0.000000e+00> : vector<8x128xf32>
    %10 = tpu.matmul %8, %9, %cst_8 {dimension_numbers = #tpu.dot_dimension_numbers<[1], [0], [0], [1], [0, 0, 1, 1], [], []>} : vector<8x128xbf16>, vector<128x128xbf16>, vector<8x128xf32> -> vector<8x128xf32>
    %c0_9 = arith.constant 0 : index
    %c0_10 = arith.constant 0 : index
    %11 = vector.load %arg5[%c0_9, %c0_10] : memref<1x128xf32, #tpu.memory_space<vmem>>, vector<1x128xf32>
    %12 = vector.broadcast %11 : vector<1x128xf32> to vector<8x128xf32>
    %13 = arith.addf %10, %12 : vector<8x128xf32>
    %cst_11 = arith.constant dense<0xFF800000> : vector<8xf32>
    %14 = vector.multi_reduction <maximumf>, %13, %cst_11 [1] : vector<8x128xf32> to vector<8xf32>
    %15 = vector.shape_cast %14 : vector<8xf32> to vector<8x1xf32>
    %16 = vector.broadcast %15 : vector<8x1xf32> to vector<8x128xf32>
    %17 = arith.subf %13, %16 : vector<8x128xf32>
    %18 = math.exp %17 : vector<8x128xf32>
    %cst_12 = arith.constant dense<0.000000e+00> : vector<8xf32>
    %19 = vector.multi_reduction <add>, %18, %cst_12 [1] : vector<8x128xf32> to vector<8xf32>
    %20 = vector.shape_cast %19 : vector<8xf32> to vector<8x1xf32>
    %cst_13 = arith.constant 1.000000e+00 : f32
    %21 = vector.broadcast %cst_13 : f32 to vector<8x1xf32>
    %22 = arith.divf %21, %20 : vector<8x1xf32>
    %23 = vector.broadcast %22 : vector<8x1xf32> to vector<8x128xf32>
    %24 = arith.mulf %18, %23 : vector<8x128xf32>
    %c0_14 = arith.constant 0 : index
    %c0_15 = arith.constant 0 : index
    %25 = vector.load %arg6[%c0_14, %c0_15] : memref<8x128xf32, #tpu.memory_space<vmem>>, vector<8x128xf32>
    tpu.vector_store %arg6[%c0_14, %c0_15], %24 {strides = array<i32>} : memref<8x128xf32, #tpu.memory_space<vmem>>, vector<8x128xf32>,
    return
  }
  func.func @transform_0(%arg0: i32) -> (i32, i32) {
    %c0_i32 = arith.constant 0 : i32
    %c0_i32_0 = arith.constant 0 : i32
    return %arg0, %c0_i32 : i32, i32
  }
  func.func @transform_1(%arg0: i32) -> (i32, i32) {
    %c0_i32 = arith.constant 0 : i32
    %c0_i32_0 = arith.constant 0 : i32
    %c0_i32_1 = arith.constant 0 : i32
    return %c0_i32, %c0_i32_0 : i32, i32
  }
  func.func @transform_2(%arg0: i32) -> (i32, i32) {
    %c0_i32 = arith.constant 0 : i32
    %c0_i32_0 = arith.constant 0 : i32
    %c0_i32_1 = arith.constant 0 : i32
    return %c0_i32, %c0_i32_0 : i32, i32
  }
  func.func @transform_3(%arg0: i32) -> (i32, i32) {
    %c0_i32 = arith.constant 0 : i32
    %c0_i32_0 = arith.constant 0 : i32
    %c0_i32_1 = arith.constant 0 : i32
    return %c0_i32, %c0_i32_0 : i32, i32
  }
  func.func @transform_4(%arg0: i32) -> (i32, i32) {
    %c0_i32 = arith.constant 0 : i32
    %c0_i32_0 = arith.constant 0 : i32
    %c0_i32_1 = arith.constant 0 : i32
    return %c0_i32, %c0_i32_0 : i32, i32
  }
  func.func @transform_5(%arg0: i32) -> (i32, i32) {
    %c0_i32 = arith.constant 0 : i32
    %c0_i32_0 = arith.constant 0 : i32
    return %arg0, %c0_i32 : i32, i32
  }
}

</mosaic_0001>

<bundles_post_ra>
// kernel: tpu_custom_call.1
= control target key start
LH: loop header
LB: loop body
LE: loop exit
PB: predicated region body
PF: predicated region fallthrough
CT: control target
= control target key end

     0   :  { %10 = vsyncpa [#allocation3], 0  ;;  %s1337_s0 = inlined_call_operand.hbm [shape: bf16[8,896], index: 0, kind: input, shape index: {}]   ;;  %s1338_s1 = inlined_call_operand.hbm [shape: bf16[896,128], index: 1, kind: input, shape index: {}]   ;;  %s1339_s2 = inlined_call_operand.vmem [shape: f32[1,128], index: 2, kind: input, shape index: {}]   ;;  %s1340_s3 = inlined_call_operand.hbm [shape: bf16[128,128], index: 3, kind: input, shape index: {}]   ;;  %s1341_s4 = inlined_call_operand.vmem [shape: f32[1,128], index: 4, kind: input, shape index: {}]   ;;  %s1342_s5 = inlined_call_operand.hbm [shape: f32[8,128], index: 5, kind: output, shape index: {}]  }
   0x1   :  { %11 = vsyncpa [#allocation6], 0 }
   0x2   :  { %12 = vsyncpa [#allocation4], 0  ;;  %s1219_s18 = smov [#allocation5]   ;;  %s1125_s22 = scalar_lea.hbm %s1338_s1, 7168 }
   0x3   :  { %s28_s19 = sshll.u32 %s1219_s18, 4  ;;  %p1126_p0 = scmp.ne.s32.totalorder %s1338_s1, %s1125_s22  ;;  %s29_s19 = int_to_ptr.vmem [resolvable:$true] %s28_s19 }
   0x4   :  { %p1129_p1 = scmp.lt.u32.totalorder %s1125_s22, %s1338_s1 }
   0x6   :  { %p1131_p2 = pnand %p1129_p1, %p1126_p0 }
   0x8   :  { %1134 = shalt.err (!%p1131_p2)
}
   0x9   :  { %s1135_s27 = scalar_lea.vmem %s29_s19, 7168  ;;  %p1140_p4 = scmp.lt.s32.totalorder %s29_s19, %s29_s19 }
   0xa   :  { %p1136_p3 = scmp.ne.s32.totalorder %s29_s19, %s1135_s27  ;;  %p1141_p5 = scmp.lt.s32.totalorder %s1135_s27, %s1135_s27 }
   0xc   :  { %p1142_p6 = por %p1141_p5, %p1140_p4 }
   0xe   :  { %p1143_p7 = pnand %p1142_p6, %p1136_p3 }
  0x10   :  { %1146 = shalt.err (!%p1143_p7)
}
  0x11   :  { %s1220_s28 = smov 64   ;;  %s1221_s29 = smov 4  }
  0x12   :  { %34 = dma.hbm_to_vmem [thread:$0]  %s1338_s1, 7168, %s29_s19, [#allocation6], %s1220_s28, %s1220_s28, %s1221_s29  }
  0x13   :  { %s1222_s7 = smov [#allocation2]   ;;  %s1223_s9 = smov [#allocation7]  }
  0x14   :  { %s19_s8 = sshll.u32 %s1222_s7, 4  ;;  %s42_s10 = sshll.u32 %s1223_s9, 4  ;;  %s20_s8 = int_to_ptr.vmem [resolvable:$true] %s19_s8  ;;  %s43_s10 = int_to_ptr.vmem [resolvable:$true] %s42_s10 }
  0x15   :  { %s1147_s13 = scalar_lea.hbm %s1337_s0, 448 }
  0x16   :  { %p1148_p8 = scmp.ne.s32.totalorder %s1337_s0, %s1147_s13  ;;  %p1151_p9 = scmp.lt.u32.totalorder %s1147_s13, %s1337_s0 }
  0x18   :  { %p1153_p10 = pnand %p1151_p9, %p1148_p8 }
  0x1a   :  { %1156 = shalt.err (!%p1153_p10)
}
  0x1b   :  { %s1157_s1 = scalar_lea.vmem %s20_s8, 448  ;;  %p1162_p12 = scmp.lt.s32.totalorder %s20_s8, %s20_s8 }
  0x1c   :  { %p1158_p11 = scmp.ne.s32.totalorder %s20_s8, %s1157_s1  ;;  %p1163_p13 = scmp.lt.s32.totalorder %s1157_s1, %s1157_s1 }
  0x1e   :  { %p1164_p0 = por %p1163_p13, %p1162_p12 }
  0x20   :  { %p1165_p1 = pnand %p1164_p0, %p1158_p11 }
  0x22   :  { %1168 = shalt.err (!%p1165_p1)
}
  0x23   :  { %22 = dma.hbm_to_vmem [thread:$0]  %s1337_s0, 448, %s20_s8, [#allocation3]  }
  0x24   :  { %s1169_s22 = scalar_lea.hbm %s1340_s3, 1024 }
  0x25   :  { %p1170_p2 = scmp.ne.s32.totalorder %s1340_s3, %s1169_s22  ;;  %p1173_p3 = scmp.lt.u32.totalorder %s1169_s22, %s1340_s3 }
  0x27   :  { %p1175_p4 = pnand %p1173_p3, %p1170_p2 }
  0x29   :  { %1178 = shalt.err (!%p1175_p4)
}
  0x2a   :  { %s1179_s27 = scalar_lea.vmem %s43_s10, 1024  ;;  %p1184_p6 = scmp.lt.s32.totalorder %s43_s10, %s43_s10 }
  0x2b   :  { %p1180_p5 = scmp.ne.s32.totalorder %s43_s10, %s1179_s27  ;;  %p1185_p7 = scmp.lt.s32.totalorder %s1179_s27, %s1179_s27 }
  0x2d   :  { %p1186_p8 = por %p1185_p7, %p1184_p6 }
  0x2f   :  { %p1187_p9 = pnand %p1186_p8, %p1180_p5 }
  0x31   :  { %1190 = shalt.err (!%p1187_p9)
}
  0x32   :  { %48 = dma.hbm_to_vmem [thread:$0]  %s1340_s3, 1024, %s43_s10, [#allocation6], %s1220_s28, %s1220_s28, %s1221_s29  }
  0x33   :  { %1213 = dma.done.wait [#allocation3], 448  }
  0x34   :  { %1214 = vsyncadd [#allocation3], 4294966848 }
  0x35   :  { %1215 = dma.done.wait [#allocation6], 8192  }
  0x36   :  { %1216 = vsyncadd [#allocation6], 4294959104  ;;  %v1050_v0 = vld [vmem:[#allocation5 + $0x40] sm:$0xff]   ;;  %v1054_v4 = vld [vmem:[#allocation5 + $0x48] sm:$0xff]   ;;  %v1224_v42 = vmov 0.0   ;;  %vm1225_vm0 = vmmov 0  }
  0x37   :  { %v1051_v1 = vld [vmem:[#allocation5] sm:$0xff]   ;;  %918 = vmatprep.subr.bf16.mxu0 %v1050_v0  ;;  %v1055_v5 = vld [vmem:[#allocation5 + $0x8] sm:$0xff]   ;;  %v1058_v8 = vld [vmem:[#allocation5 + $0x50] sm:$0xff]   ;;  %s1226_s6 = smov [#allocation8]  }
  0x38   :  { %v1052_v2 = vld [vmem:[#allocation5 + $0xc0] sm:$0xff]   ;;  %919 = vmatpush3.bf16.msra.mxu0 %v1051_v1  ;;  %v1056_v6 = vld [vmem:[#allocation5 + $0xc8] sm:$0xff]   ;;  %v1059_v9 = vld [vmem:[#allocation5 + $0x10] sm:$0xff]   ;;  %s835_s7 = sshll.u32 %s1226_s6, 4  ;;  %s836_s7 = int_to_ptr.vmem [resolvable:$true] %s835_s7 }
  0x39   :  { %v1053_v3 = vld [vmem:[#allocation5 + $0x80] sm:$0xff]   ;;  %940 = vmatprep.subr.bf16.mxu1 %v1052_v2  ;;  %920 = vmatprep.subr.bf16.mxu0 %v1054_v4  ;;  %v1057_v7 = vld [vmem:[#allocation5 + $0x88] sm:$0xff]   ;;  %v1060_v10 = vld [vmem:[#allocation5 + $0xd0] sm:$0xff]   ;;  %p1196_p11 = scmp.lt.s32.totalorder %s836_s7, %s836_s7 }
  0x3a   :  { %941 = vmatpush3.bf16.msra.mxu1 %v1053_v3  ;;  %v1061_v11 = vld [vmem:[#allocation5 + $0x90] sm:$0xff]   ;;  %v1062_v12 = vld [vmem:[#allocation5 + $0x58] sm:$0xff]   ;;  %v1066_v16 = vld [vmem:[#allocation5 + $0x60] sm:$0xff]  }
  0x3b   :  { %942 = vmatprep.subr.bf16.mxu1 %v1056_v6  ;;  %v1063_v13 = vld [vmem:[#allocation5 + $0x18] sm:$0xff]   ;;  %v1067_v17 = vld [vmem:[#allocation5 + $0x20] sm:$0xff]   ;;  %v1070_v20 = vld [vmem:[#allocation5 + $0x68] sm:$0xff]  }
  0x3c   :  { %921 = vmatpush3.bf16.msra.mxu0 %v1055_v5  ;;  %v1064_v14 = vld [vmem:[#allocation5 + $0xd8] sm:$0xff]   ;;  %v1068_v18 = vld [vmem:[#allocation5 + $0xe0] sm:$0xff]   ;;  %v1071_v21 = vld [vmem:[#allocation5 + $0x28] sm:$0xff]  }
  0x3d   :  { %922 = vmatprep.subr.bf16.mxu0 %v1058_v8  ;;  %v1065_v15 = vld [vmem:[#allocation5 + $0x98] sm:$0xff]   ;;  %v1069_v19 = vld [vmem:[#allocation5 + $0xa0] sm:$0xff]   ;;  %v1072_v22 = vld [vmem:[#allocation5 + $0xe8] sm:$0xff]  }
  0x3e   :  { %943 = vmatpush3.bf16.msra.mxu1 %v1057_v7  ;;  %v1073_v23 = vld [vmem:[#allocation5 + $0xa8] sm:$0xff]   ;;  %v1074_v24 = vld [vmem:[#allocation5 + $0x70] sm:$0xff]   ;;  %v1078_v28 = vld [vmem:[#allocation5 + $0x78] sm:$0xff]  }
  0x3f   :  { %944 = vmatprep.subr.bf16.mxu1 %v1060_v10  ;;  %v1075_v25 = vld [vmem:[#allocation5 + $0x30] sm:$0xff]   ;;  %v1079_v29 = vld [vmem:[#allocation5 + $0x38] sm:$0xff]   ;;  %v61_v31 = vld [vmem:[#allocation2] sm:$0xff] }
  0x40   :  { %923 = vmatpush3.bf16.msra.mxu0 %v1059_v9  ;;  %v1076_v26 = vld [vmem:[#allocation5 + $0xf0] sm:$0xff]   ;;  %v1080_v30 = vld [vmem:[#allocation5 + $0xf8] sm:$0xff]   ;;  %v846_v32 = vcombine.low %v61_v31, %v61_v31  ;;  %v847_v33 = vcombine.high %v61_v31, %v61_v31  ;;  %v1084_v35 = vld [vmem:[#allocation5 + $0x140] sm:$0xff]  }
  0x41   :  { %924 = vmatprep.subr.bf16.mxu0 %v1062_v12  ;;  %v1077_v27 = vld [vmem:[#allocation5 + $0xb0] sm:$0xff]   ;;  %v1083_v34 = vld [vmem:[#allocation5 + $0xb8] sm:$0xff]   ;;  %v1087_v39 = vld [vmem:[#allocation5 + $0x100] sm:$0xff]  }
  0x42   :  { %945 = vmatpush3.bf16.msra.mxu1 %v1061_v11  ;;  %v62_v36 = vld [vmem:[#allocation2 + $0x8] sm:$0xff]  ;;  %577 = vmatprep.mubr.bf16.mxu0 %v847_v33  ;;  %v1088_v40 = vld [vmem:[#allocation5 + $0x180] sm:$0xff]   ;;  %v1095_v48 = vld [vmem:[#allocation5 + $0x158] sm:$0xff]  }
  0x43   :  { %946 = vmatprep.subr.bf16.mxu1 %v1064_v14  ;;  %v848_v37 = vcombine.low %v62_v36, %v62_v36  ;;  %v849_v38 = vcombine.high %v62_v36, %v62_v36  ;;  %v1089_v41 = vld [vmem:[#allocation5 + $0x148] sm:$0xff]   ;;  %v1092_v45 = vld [vmem:[#allocation5 + $0x150] sm:$0xff]   ;;  %v1096_v49 = vld [vmem:[#allocation5 + $0x118] sm:$0xff]  }
  0x44   :  { %925 = vmatpush3.bf16.msra.mxu0 %v1063_v13  ;;  %v1090_v43 = vld [vmem:[#allocation5 + $0x108] sm:$0xff]   ;;  %v1093_v46 = vld [vmem:[#allocation5 + $0x110] sm:$0xff]   ;;  %v1098_v50 = vld [vmem:[#allocation5 + $0x160] sm:$0xff]  }
  0x45   :  { %926 = vmatprep.subr.bf16.mxu0 %v1066_v16  ;;  %617 = vmatprep.mubr.bf16.mxu1 %v849_v38  ;;  %v1091_v44 = vld [vmem:[#allocation5 + $0x188] sm:$0xff]   ;;  %v1094_v47 = vld [vmem:[#allocation5 + $0x190] sm:$0xff]   ;;  %v1097_v51 = vld [vmem:[#allocation5 + $0x198] sm:$0xff]  }
  0x46   :  { %947 = vmatpush3.bf16.msra.mxu1 %v1065_v15  ;;  %v1099_v52 = vld [vmem:[#allocation5 + $0x120] sm:$0xff]   ;;  %v1101_v53 = vld [vmem:[#allocation5 + $0x168] sm:$0xff]   ;;  %v1104_v56 = vld [vmem:[#allocation5 + $0x170] sm:$0xff]  }
  0x47   :  { %948 = vmatprep.subr.bf16.mxu1 %v1068_v18  ;;  %v1100_v54 = vld [vmem:[#allocation5 + $0x1a0] sm:$0xff]   ;;  %v1102_v55 = vld [vmem:[#allocation5 + $0x128] sm:$0xff]   ;;  %v1105_v58 = vld [vmem:[#allocation5 + $0x130] sm:$0xff]  }
  0x48   :  { %927 = vmatpush3.bf16.msra.mxu0 %v1067_v17  ;;  %v1103_v57 = vld [vmem:[#allocation5 + $0x1a8] sm:$0xff]   ;;  %v63_v59 = vld [vmem:[#allocation2 + $0x10] sm:$0xff]  ;;  %v1112_v2 = vld [vmem:[#allocation2 + $0x18] ss:$0 sps:$4 sm:$0xff]  }
  0x49   :  { %928 = vmatprep.subr.bf16.mxu0 %v1070_v20  ;;  %v1106_v60 = vld [vmem:[#allocation5 + $0x1b0] sm:$0xff]   ;;  %v851_v61 = vcombine.high %v63_v59, %v63_v59  ;;  %v1107_v62 = vld [vmem:[#allocation5 + $0x178] sm:$0xff]   ;;  %v850_v1 = vcombine.low %v63_v59, %v63_v59  ;;  %v1113_v3 = vld [vmem:[#allocation7] sm:$0xff]  }
  0x4a   :  { %949 = vmatpush3.bf16.msra.mxu1 %v1069_v19  ;;  %v1108_v63 = vld [vmem:[#allocation5 + $0x138] sm:$0xff]   ;;  %v1114_v4 = vld [vmem:[#allocation7 + $0x8] sm:$0xff]   ;;  %v1115_v5 = vld [vmem:[#allocation7 + $0x10] sm:$0xff]  }
  0x4b   :  { %950 = vmatprep.subr.bf16.mxu1 %v1072_v22  ;;  %v1111_v0 = vld [vmem:[#allocation5 + $0x1b8] sm:$0xff]   ;;  %v1117_v7 = vld [vmem:[#allocation7 + $0x20] sm:$0xff]   ;;  %v1118_v8 = vld [vmem:[#allocation7 + $0x28] sm:$0xff]  }
  0x4c   :  { %929 = vmatpush3.bf16.msra.mxu0 %v1071_v21  ;;  %v1116_v6 = vld [vmem:[#allocation7 + $0x18] sm:$0xff]   ;;  %v1119_v9 = vld [vmem:[#allocation7 + $0x30] sm:$0xff]   ;;  %v845_v12 = vld [vmem:[%s1339_s2] ss:$0 sm:$0xff] }
  0x4d   :  { %930 = vmatprep.subr.bf16.mxu0 %v1074_v24  ;;  %v1120_v10 = vld [vmem:[#allocation7 + $0x38] sm:$0xff]  }
  0x4e   :  { %951 = vmatpush3.bf16.msra.mxu1 %v1073_v23 }
  0x4f   :  { %952 = vmatprep.subr.bf16.mxu1 %v1076_v26 }
  0x50   :  { %931 = vmatpush3.bf16.msra.mxu0 %v1075_v25 }
  0x51   :  { %932 = vmatprep.subr.bf16.mxu0 %v1078_v28 }
  0x52   :  { %953 = vmatpush3.bf16.msra.mxu1 %v1077_v27 }
  0x53   :  { %954 = vmatprep.subr.bf16.mxu1 %v1080_v30 }
  0x54   :  { %933 = vmatpush3.bf16.msra.mxu0 %v1079_v29 }
  0x55   :  { %962 = vmatprep.subr.bf16.mxu0 %v1084_v35 }
  0x56   :  { %955 = vmatpush3.bf16.msra.mxu1 %v1083_v34 }
  0x57   :  { %578 = vmatmul.mubr.bf16.vlgmr.msra.gmra.mrb[0].mxu0 %v846_v32  ;;  %1002 = vmatprep.subr.bf16.mxu1 %v1224_v42 }
  0x58   :  { %963 = vmatpush3.bf16.msra.mxu0 %v1087_v39  ;;  %657 = vmatprep.mubr.bf16.mxu0 %v851_v61 }
  0x59   :  { %618 = vmatmul.mubr.bf16.vlgmr.msra.gmra.mrb[0].mxu1 %v848_v37  ;;  %964 = vmatprep.subr.bf16.mxu0 %v1089_v41  ;;  %v909_v37 = vld [vmem:[%s1341_s4] ss:$0 sm:$0xff]  ;;  %s1191_s4 = scalar_lea.vmem %s836_s7, 128 }
  0x5a   :  { %1003 = vmatpush3.bf16.msra.mxu1 %v1088_v40  ;;  %1018 = vmatprep.mubr.msk.bf16.mxu1 %vm1225_vm0, %v1224_v42  ;;  %p1192_p10 = scmp.ne.s32.totalorder %s836_s7, %s1191_s4  ;;  %p1197_p12 = scmp.lt.s32.totalorder %s1191_s4, %s1191_s4 }
  0x5b   :  { %1004 = vmatprep.subr.bf16.mxu1 %v1224_v42 }
  0x5c   :  { %965 = vmatpush3.bf16.msra.mxu0 %v1090_v43  ;;  %p1198_p13 = por %p1197_p12, %p1196_p11 }
  0x5d   :  { %966 = vmatprep.subr.bf16.mxu0 %v1092_v45 }
  0x5e   :  { %1005 = vmatpush3.bf16.msra.mxu1 %v1091_v44  ;;  %p1199_p0 = pnand %p1198_p13, %p1192_p10 }
  0x5f   :  { %1006 = vmatprep.subr.bf16.mxu1 %v1224_v42 }
  0x60   :  { %967 = vmatpush3.bf16.msra.mxu0 %v1093_v46 }
  0x61   :  { %968 = vmatprep.subr.bf16.mxu0 %v1095_v48 }
  0x62   :  { %1007 = vmatpush3.bf16.msra.mxu1 %v1094_v47 }
  0x63   :  { %1008 = vmatprep.subr.bf16.mxu1 %v1224_v42 }
  0x64   :  { %969 = vmatpush3.bf16.msra.mxu0 %v1096_v49 }
  0x65   :  { %970 = vmatprep.subr.bf16.mxu0 %v1098_v50 }
  0x66   :  { %1009 = vmatpush3.bf16.msra.mxu1 %v1097_v51 }
  0x67   :  { %1010 = vmatprep.subr.bf16.mxu1 %v1224_v42 }
  0x68   :  { %971 = vmatpush3.bf16.msra.mxu0 %v1099_v52 }
  0x69   :  { %972 = vmatprep.subr.bf16.mxu0 %v1101_v53 }
  0x6a   :  { %1011 = vmatpush3.bf16.msra.mxu1 %v1100_v54 }
  0x6b   :  { %1012 = vmatprep.subr.bf16.mxu1 %v1224_v42 }
  0x6c   :  { %973 = vmatpush3.bf16.msra.mxu0 %v1102_v55 }
  0x6d   :  { %974 = vmatprep.subr.bf16.mxu0 %v1104_v56 }
  0x6e   :  { %1013 = vmatpush3.bf16.msra.mxu1 %v1103_v57 }
  0x6f   :  { %1014 = vmatprep.subr.bf16.mxu1 %v1224_v42 }
  0x70   :  { %975 = vmatpush3.bf16.msra.mxu0 %v1105_v58 }
  0x71   :  { %976 = vmatprep.subr.bf16.mxu0 %v1107_v62 }
  0x72   :  { %1015 = vmatpush3.bf16.msra.mxu1 %v1106_v60 }
  0x73   :  { %1016 = vmatprep.subr.bf16.mxu1 %v1224_v42 }
  0x74   :  { %977 = vmatpush3.bf16.msra.mxu0 %v1108_v63 }
  0x75   :  { %1022 = vmatprep.subr.bf16.mxu0 %v1224_v42 }
  0x76   :  { %1017 = vmatpush3.bf16.msra.mxu1 %v1111_v0 }
  0x77   :  { %658 = vmatmul.mubr.bf16.vlgmr.msra.gmra.mrb[4].mxu0 %v850_v1 }
  0x78   :  { %1038 = vmatprep.mubr.msk.bf16.mxu0 %vm1225_vm0, %v1224_v42  ;;  %1023 = vmatpush3.bf16.msra.mxu0 %v1113_v3 }
  0x79   :  { %1019 = vmatmul.mubr.bf16.vlgmr.msra.gmra.mrb[4].mxu1 %v1112_v2  ;;  %1024 = vmatprep.subr.bf16.mxu0 %v1224_v42 }
  0x7c   :  { %1025 = vmatpush3.bf16.msra.mxu0 %v1114_v4 }
  0x7d   :  { %1026 = vmatprep.subr.bf16.mxu0 %v1224_v42 }
  0x80   :  { %1027 = vmatpush3.bf16.msra.mxu0 %v1115_v5 }
  0x81   :  { %1028 = vmatprep.subr.bf16.mxu0 %v1224_v42 }
  0x84   :  { %1029 = vmatpush3.bf16.msra.mxu0 %v1116_v6 }
  0x85   :  { %1030 = vmatprep.subr.bf16.mxu0 %v1224_v42 }
  0x88   :  { %1031 = vmatpush3.bf16.msra.mxu0 %v1117_v7 }
  0x89   :  { %1032 = vmatprep.subr.bf16.mxu0 %v1224_v42 }
  0x8c   :  { %1033 = vmatpush3.bf16.msra.mxu0 %v1118_v8 }
  0x8d   :  { %1034 = vmatprep.subr.bf16.mxu0 %v1224_v42 }
  0x90   :  { %1035 = vmatpush3.bf16.msra.mxu0 %v1119_v9 }
  0x91   :  { %1036 = vmatprep.subr.bf16.mxu0 %v1224_v42 }
  0x94   :  { %1037 = vmatpush3.bf16.msra.mxu0 %v1120_v10 }
 0x12a   :  { %v934_v11 = vpop.f32.mrb[0].mxu0 }
 0x12b   :  { %v935_v13 = vpop.f32.mrb[1].mxu0 }
 0x12c   :  { %v936_v14 = vadd.f32 %v935_v13, %v934_v11  ;;  %v937_v15 = vpop.f32.mrb[2].mxu0  ;;  %v956_v16 = vpop.f32.mrb[0].mxu1 }
 0x12d   :  { %v938_v17 = vpop.f32.mrb[3].mxu0  ;;  %v957_v18 = vpop.f32.mrb[1].mxu1 }
 0x12e   :  { %v580_v19 = vadd.f32 %v936_v14, %v845_v12  ;;  %v958_v20 = vadd.f32 %v957_v18, %v956_v16  ;;  %v959_v21 = vpop.f32.mrb[2].mxu1 }
 0x12f   :  { %v960_v22 = vpop.f32.mrb[3].mxu1 }
 0x130   :  { %v620_v23 = vadd.f32 %v958_v20, %v580_v19 }
 0x14a   :  { %v978_v24 = vpop.f32.mrb[4].mxu0 }
 0x14b   :  { %v979_v25 = vpop.f32.mrb[5].mxu0 }
 0x14c   :  { %v980_v26 = vadd.f32 %v979_v25, %v978_v24  ;;  %v981_v27 = vpop.f32.mrb[6].mxu0  ;;  %v699_v28 = vpop.f32.mrb[4].mxu1 }
 0x14d   :  { %v982_v29 = vpop.f32.mrb[7].mxu0  ;;  %v1020_v30 = vpop.f32.mrb[5].mxu1 }
 0x14e   :  { %v660_v31 = vadd.f32 %v980_v26, %v620_v23  ;;  %v702_v32 = vpop.f32.mrb[6].mxu1 }
 0x14f   :  { %v1021_v33 = vpop.f32.mrb[7].mxu1 }
 0x150   :  { %v700_v34 = vadd.f32 %v699_v28, %v660_v31 }
 0x152   :  { %v705_v35 = vmax.f32 %v700_v34, 0.0 }
 0x154   :  { %v706_v36 = vpack.c.bf16 %v705_v35, %v705_v35 }
 0x156   :  { %1039 = vmatmul.mubr.bf16.vlgmr.msra.gmra.mrb[8].mxu0 %v706_v36 }
 0x229   :  { %v812_v38 = vpop.f32.mrb[8].mxu0 }
 0x22a   :  { %v813_v39 = vadd.f32 %v909_v37, %v812_v38  ;;  %v1040_v40 = vpop.f32.mrb[9].mxu0 }
 0x22b   :  { %v815_v41 = vpop.f32.mrb[10].mxu0 }
 0x22c   :  { %818 = vmax.xlane.f32.xlu0 %v813_v39  ;;  %v1041_v42 = vpop.f32.mrb[11].mxu0 }
 0x2b9   :  { %v819_v43 = vpop.xlane.xlu0 %818 }
 0x2ba   :  { %v820_v44 = vsub.f32 %v813_v39, %v819_v43 }
 0x2bc   :  { %v821_v45 = vmul.f32 1.442695, %v820_v44 }
 0x2be   :  { %1121 = vpow2.f32 %v821_v45 }
 0x2c8   :  { %v1122_v46 = vpop.eup %1121 }
 0x2c9   :  { %823 = vadd.xlane.f32.xlu0 %v1122_v46 }
 0x356   :  { %v824_v47 = vpop.xlane.xlu0 %823 }
 0x357   :  { %1123 = vrcp.f32 %v824_v47 }
 0x361   :  { %v1124_v48 = vpop.eup %1123 }
 0x362   :  { %v827_v49 = vmul.f32 %v1124_v48, %v1122_v46 }
 0x364   :  { %828 = vst [vmem:[#allocation8] sm:$0xff] %v827_v49 }
 0x365   :  { %1202 = shalt.err (!%p1199_p0)
}
 0x366   :  { %s1203_s10 = scalar_lea.hbm %s1342_s5, 128 }
 0x367   :  { %p1204_p1 = scmp.ne.s32.totalorder %s1342_s5, %s1203_s10  ;;  %p1207_p2 = scmp.lt.u32.totalorder %s1203_s10, %s1342_s5 }
 0x369   :  { %p1209_p3 = pnand %p1207_p2, %p1204_p1 }
 0x36b   :  { %1212 = shalt.err (!%p1209_p3)
}
 0x36c   :  { %838 = dma.vmem_to_hbm [thread:$0]  %s836_s7, 128, %s1342_s5, [#allocation4]  }
 0x36d   :  { %1217 = dma.done.wait [#allocation4], 128  }
 0x36e   :  { %1218 = vsyncadd [#allocation4], 4294967168 }
 0x36f   :  { %842 = vsyncpa [#allocation3], 1 }
 0x370   :  { %843 = vsyncpa [#allocation6], 1 }
 0x371   :  { %844 = vsyncpa [#allocation4], 1 }

</bundles_post_ra>
